<compile_context>
chip_gen: v5e
topology: v5e:2x2
jax: 0.10.0
libtpu: 0.0.40
codegen_flags: <defaults>
</compile_context>

<pallas_src>
import functools

import jax
import jax.numpy as jnp
import numpy as np
from jax.experimental import pallas as pl
from jax.experimental.pallas import tpu as pltpu


def _round_up(x, m):
    return (x + m - 1) // m * m


def mlp_kernel(x_ref, w1_ref, b1_ref, w2_ref, b2_ref, o_ref):
    # Matmul 1 on the MXU (bf16 in, f32 accumulate); bias + ReLU on the VPU in f32.
    h = jnp.dot(x_ref[...], w1_ref[...], preferred_element_type=jnp.float32) + b1_ref[...]
    h = jnp.maximum(h, 0.0)
    # Cast back to the weight dtype so matmul 2 stays on the fast bf16 MXU path.
    y = jnp.dot(h.astype(w2_ref.dtype), w2_ref[...],
                preferred_element_type=jnp.float32) + b2_ref[...]
    o_ref[...] = y.astype(o_ref.dtype)


def _weight_spec(block_shape, single_buffer):
    """Constant-index (VMEM-resident) operand; single-buffered when supported."""
    if single_buffer:
        return pl.BlockSpec(block_shape, lambda i: (0, 0), pipeline_mode=pl.Buffered(1))
    return pl.BlockSpec(block_shape, lambda i: (0, 0))


@functools.partial(
    jax.jit,
    static_argnames=("out_dim", "tile_m", "out_dtype", "single_buffer_weights"),
)
def _bob_forward(x, w1p, b1p, w2p, b2p, *, out_dim, tile_m, out_dtype,
                 single_buffer_weights):
    B, Din = x.shape
    Din_pad, H_pad = w1p.shape
    Dout_pad = w2p.shape[1]
    compute_dtype = w1p.dtype

    # --- batch tiling (multiple of 8 sublanes) ------------------------------
    tm = max(8, _round_up(int(tile_m), 8))
    TM = min(tm, _round_up(B, 8))
    B_pad = _round_up(B, TM)

    # Zero-pad x (batch rows + K columns); padding contributes exactly 0 to the result.
    xp = jnp.zeros((B_pad, Din_pad), compute_dtype).at[:B, :Din].set(
        x.astype(compute_dtype))

    grid = (pl.cdiv(B_pad, TM),)

    cd_bytes = np.dtype(compute_dtype).itemsize
    out_bytes = np.dtype(out_dtype).itemsize

    # VMEM budget: x (2 bufs) + weights (1 buf) + biases + out (2 bufs) + f32 intermediates.
    vmem_needed = (
        2 * TM * Din_pad * cd_bytes
        + (Din_pad * H_pad + H_pad * Dout_pad) * cd_bytes
        + (H_pad + Dout_pad) * 4
        + 2 * TM * Dout_pad * out_bytes
        + TM * H_pad * 4 + TM * Dout_pad * 4
    )
    vmem_limit = int(min(max(int(1.5 * vmem_needed) + (4 << 20), 16 << 20), 96 << 20))

    cost = pl.CostEstimate(
        flops=2 * B_pad * (Din_pad * H_pad + H_pad * Dout_pad),
        transcendentals=0,
        bytes_accessed=(B_pad * Din_pad * cd_bytes
                        + (Din_pad * H_pad + H_pad * Dout_pad) * cd_bytes
                        + (H_pad + Dout_pad) * 4
                        + B_pad * Dout_pad * out_bytes),
    )

    out = pl.pallas_call(
        mlp_kernel,
        out_shape=jax.ShapeDtypeStruct((B_pad, Dout_pad), out_dtype),
        grid_spec=pl.GridSpec(
            grid=grid,
            in_specs=[
                pl.BlockSpec((TM, Din_pad), lambda i: (i, 0)),        # x: tiled over batch
                _weight_spec((Din_pad, H_pad), single_buffer_weights),    # W1 resident
                _weight_spec((1, H_pad), single_buffer_weights),          # b1 resident
                _weight_spec((H_pad, Dout_pad), single_buffer_weights),   # W2 resident
                _weight_spec((1, Dout_pad), single_buffer_weights),       # b2 resident
            ],
            out_specs=pl.BlockSpec((TM, Dout_pad), lambda i: (i, 0)),
        ),
        compiler_params=pltpu.CompilerParams(
            # Batch axis independent -> shard across TensorCores on v7x; harmless elsewhere.
            dimension_semantics=("parallel",),
            vmem_limit_bytes=vmem_limit,
        ),
        cost_estimate=cost,
    )(xp, w1p, b1p, w2p, b2p)

    return out[:B, :out_dim]


class BobPallas:
    """Pallas equivalent of Bob: Linear -> ReLU -> Linear, weights prepared once."""

    def __init__(self, w1, b1, w2, b2, *, tile_m=256, compute_dtype=jnp.bfloat16):
        Din, H = w1.shape
        Dout = w2.shape[1]
        Din_pad = _round_up(Din, 128)
        H_pad = _round_up(H, 128)
        Dout_pad = _round_up(Dout, 128)

        self.out_dim = Dout
        self.tile_m = tile_m
        # Pad + cast ONCE (hoisted out of the per-step forward, per perf review).
        self.w1p = jnp.zeros((Din_pad, H_pad), compute_dtype).at[:Din, :H].set(
            w1.astype(compute_dtype))
        self.b1p = jnp.zeros((1, H_pad), jnp.float32).at[:, :H].set(
            b1.astype(jnp.float32).reshape(1, H))
        self.w2p = jnp.zeros((H_pad, Dout_pad), compute_dtype).at[:H, :Dout].set(
            w2.astype(compute_dtype))
        self.b2p = jnp.zeros((1, Dout_pad), jnp.float32).at[:, :Dout].set(
            b2.astype(jnp.float32).reshape(1, Dout))
        self._single_buffer_weights = True

    def __call__(self, x, out_dtype=None):
        out_dtype = out_dtype if out_dtype is not None else x.dtype
        kwargs = dict(out_dim=self.out_dim, tile_m=self.tile_m, out_dtype=out_dtype)
        if self._single_buffer_weights:
            try:
                return _bob_forward(x, self.w1p, self.b1p, self.w2p, self.b2p,
                                    single_buffer_weights=True, **kwargs)
            except Exception:
                # pipeline_mode=pl.Buffered(1) not supported on this JAX version;
                # fall back to default (double-buffered) resident weights.
                self._single_buffer_weights = False
        return _bob_forward(x, self.w1p, self.b1p, self.w2p, self.b2p,
                            single_buffer_weights=False, **kwargs)


def init_params(key, input_dim, hidden_dim, output_dim):
    # Deterministic init mirroring nn.Linear's kaiming-uniform-ish scale.
    k1, k2, k3, k4 = jax.random.split(key, 4)
    s1 = 1.0 / jnp.sqrt(input_dim)
    s2 = 1.0 / jnp.sqrt(hidden_dim)
    w1 = jax.random.uniform(k1, (input_dim, hidden_dim), jnp.float32, -s1, s1)
    b1 = jax.random.uniform(k2, (1, hidden_dim), jnp.float32, -s1, s1)
    w2 = jax.random.uniform(k3, (hidden_dim, output_dim), jnp.float32, -s2, s2)
    b2 = jax.random.uniform(k4, (1, output_dim), jnp.float32, -s2, s2)
    return w1, b1, w2, b2


if __name__ == "__main__":
    key = jax.random.PRNGKey(0)
    kx, kp = jax.random.split(key)

    batch, input_dim, hidden_dim, output_dim = 8, 32, 64, 16
    x = jax.random.normal(kx, (batch, input_dim), jnp.float32)
    w1, b1, w2, b2 = init_params(kp, input_dim, hidden_dim, output_dim)

    model = BobPallas(w1, b1, w2, b2)
    out = model(x)
    jax.block_until_ready(out)

    # Reference check in plain JAX (f32). Tolerance loosened because the kernel computes
    # in bf16 with f32 accumulation.
    ref = jnp.maximum(x @ w1 + b1, 0.0) @ w2 + b2
    assert out.shape == (batch, output_dim)
    assert jnp.allclose(out, ref, atol=5e-2, rtol=5e-2), float(jnp.max(jnp.abs(out - ref)))

    print("KERNEL_OK")
</pallas_src>

<mosaic_0001>
module attributes {stable_mosaic.version = 11 : i64} {
  func.func @mlp_kernel(%arg0: i32, %arg1: memref<8x128xbf16, #tpu.memory_space<vmem>>, %arg2: memref<128x128xbf16, #tpu.memory_space<vmem>>, %arg3: memref<1x128xf32, #tpu.memory_space<vmem>>, %arg4: memref<128x128xbf16, #tpu.memory_space<vmem>>, %arg5: memref<1x128xf32, #tpu.memory_space<vmem>>, %arg6: memref<8x128xf32, #tpu.memory_space<vmem>>) attributes {dimension_semantics = [#tpu.dimension_semantics<parallel>], iteration_bounds = array<i64: 1>, scalar_prefetch = 0 : i64, scratch_operands = 0 : i64, tpu.core_type = #tpu.core_type<tc>, window_params = [{transform_indices = @transform_0, window_bounds = array<i64: 8, 128>}, {pipeline_mode = #tpu.pipeline_mode<synchronous>, transform_indices = @transform_1, window_bounds = array<i64: 128, 128>}, {pipeline_mode = #tpu.pipeline_mode<synchronous>, transform_indices = @transform_2, window_bounds = array<i64: 1, 128>}, {pipeline_mode = #tpu.pipeline_mode<synchronous>, transform_indices = @transform_3, window_bounds = array<i64: 128, 128>}, {pipeline_mode = #tpu.pipeline_mode<synchronous>, transform_indices = @transform_4, window_bounds = array<i64: 1, 128>}, {transform_indices = @transform_5, window_bounds = array<i64: 8, 128>}]} {
    %c0 = arith.constant 0 : index
    %c0_0 = arith.constant 0 : index
    %0 = vector.load %arg1[%c0, %c0_0] : memref<8x128xbf16, #tpu.memory_space<vmem>>, vector<8x128xbf16>
    %c0_1 = arith.constant 0 : index
    %c0_2 = arith.constant 0 : index
    %1 = vector.load %arg2[%c0_1, %c0_2] : memref<128x128xbf16, #tpu.memory_space<vmem>>, vector<128x128xbf16>
    %cst = arith.constant dense<0.000000e+00> : vector<8x128xf32>
    %2 = tpu.matmul %0, %1, %cst {dimension_numbers = #tpu.dot_dimension_numbers<[1], [0], [0], [1], [0, 0, 1, 1], [], []>} : vector<8x128xbf16>, vector<128x128xbf16>, vector<8x128xf32> -> vector<8x128xf32>
    %c0_3 = arith.constant 0 : index
    %c0_4 = arith.constant 0 : index
    %3 = vector.load %arg3[%c0_3, %c0_4] : memref<1x128xf32, #tpu.memory_space<vmem>>, vector<1x128xf32>
    %4 = vector.broadcast %3 : vector<1x128xf32> to vector<8x128xf32>
    %5 = arith.addf %2, %4 : vector<8x128xf32>
    %cst_5 = arith.constant 0.000000e+00 : f32
    %6 = vector.broadcast %cst_5 : f32 to vector<8x128xf32>
    %7 = arith.maximumf %5, %6 : vector<8x128xf32>
    %8 = arith.truncf %7 : vector<8x128xf32> to vector<8x128xbf16>
    %c0_6 = arith.constant 0 : index
    %c0_7 = arith.constant 0 : index
    %9 = vector.load %arg4[%c0_6, %c0_7] : memref<128x128xbf16, #tpu.memory_space<vmem>>, vector<128x128xbf16>
    %cst_8 = arith.constant dense<0.000000e+00> : vector<8x128xf32>
    %10 = tpu.matmul %8, %9, %cst_8 {dimension_numbers = #tpu.dot_dimension_numbers<[1], [0], [0], [1], [0, 0, 1, 1], [], []>} : vector<8x128xbf16>, vector<128x128xbf16>, vector<8x128xf32> -> vector<8x128xf32>
    %c0_9 = arith.constant 0 : index
    %c0_10 = arith.constant 0 : index
    %11 = vector.load %arg5[%c0_9, %c0_10] : memref<1x128xf32, #tpu.memory_space<vmem>>, vector<1x128xf32>
    %12 = vector.broadcast %11 : vector<1x128xf32> to vector<8x128xf32>
    %13 = arith.addf %10, %12 : vector<8x128xf32>
    %c0_11 = arith.constant 0 : index
    %c0_12 = arith.constant 0 : index
    %14 = vector.load %arg6[%c0_11, %c0_12] : memref<8x128xf32, #tpu.memory_space<vmem>>, vector<8x128xf32>
    tpu.vector_store %arg6[%c0_11, %c0_12], %13 {strides = array<i32>} : memref<8x128xf32, #tpu.memory_space<vmem>>, vector<8x128xf32>,
    return
  }
  func.func @transform_0(%arg0: i32) -> (i32, i32) {
    %c0_i32 = arith.constant 0 : i32
    %c0_i32_0 = arith.constant 0 : i32
    return %arg0, %c0_i32 : i32, i32
  }
  func.func @transform_1(%arg0: i32) -> (i32, i32) {
    %c0_i32 = arith.constant 0 : i32
    %c0_i32_0 = arith.constant 0 : i32
    %c0_i32_1 = arith.constant 0 : i32
    return %c0_i32, %c0_i32_0 : i32, i32
  }
  func.func @transform_2(%arg0: i32) -> (i32, i32) {
    %c0_i32 = arith.constant 0 : i32
    %c0_i32_0 = arith.constant 0 : i32
    %c0_i32_1 = arith.constant 0 : i32
    return %c0_i32, %c0_i32_0 : i32, i32
  }
  func.func @transform_3(%arg0: i32) -> (i32, i32) {
    %c0_i32 = arith.constant 0 : i32
    %c0_i32_0 = arith.constant 0 : i32
    %c0_i32_1 = arith.constant 0 : i32
    return %c0_i32, %c0_i32_0 : i32, i32
  }
  func.func @transform_4(%arg0: i32) -> (i32, i32) {
    %c0_i32 = arith.constant 0 : i32
    %c0_i32_0 = arith.constant 0 : i32
    %c0_i32_1 = arith.constant 0 : i32
    return %c0_i32, %c0_i32_0 : i32, i32
  }
  func.func @transform_5(%arg0: i32) -> (i32, i32) {
    %c0_i32 = arith.constant 0 : i32
    %c0_i32_0 = arith.constant 0 : i32
    return %arg0, %c0_i32 : i32, i32
  }
}

module attributes {stable_mosaic.version = 11 : i64} {
  func.func @mlp_kernel(%arg0: i32, %arg1: memref<8x128xbf16, #tpu.memory_space<vmem>>, %arg2: memref<128x128xbf16, #tpu.memory_space<vmem>>, %arg3: memref<1x128xf32, #tpu.memory_space<vmem>>, %arg4: memref<128x128xbf16, #tpu.memory_space<vmem>>, %arg5: memref<1x128xf32, #tpu.memory_space<vmem>>, %arg6: memref<8x128xf32, #tpu.memory_space<vmem>>) attributes {dimension_semantics = [#tpu.dimension_semantics<parallel>], iteration_bounds = array<i64: 1>, scalar_prefetch = 0 : i64, scratch_operands = 0 : i64, tpu.core_type = #tpu.core_type<tc>, window_params = [{transform_indices = @transform_0, window_bounds = array<i64: 8, 128>}, {pipeline_mode = #tpu.pipeline_mode<synchronous>, transform_indices = @transform_1, window_bounds = array<i64: 128, 128>}, {pipeline_mode = #tpu.pipeline_mode<synchronous>, transform_indices = @transform_2, window_bounds = array<i64: 1, 128>}, {pipeline_mode = #tpu.pipeline_mode<synchronous>, transform_indices = @transform_3, window_bounds = array<i64: 128, 128>}, {pipeline_mode = #tpu.pipeline_mode<synchronous>, transform_indices = @transform_4, window_bounds = array<i64: 1, 128>}, {transform_indices = @transform_5, window_bounds = array<i64: 8, 128>}]} {
    %c0 = arith.constant 0 : index
    %c0_0 = arith.constant 0 : index
    %0 = vector.load %arg1[%c0, %c0_0] : memref<8x128xbf16, #tpu.memory_space<vmem>>, vector<8x128xbf16>
    %c0_1 = arith.constant 0 : index
    %c0_2 = arith.constant 0 : index
    %1 = vector.load %arg2[%c0_1, %c0_2] : memref<128x128xbf16, #tpu.memory_space<vmem>>, vector<128x128xbf16>
    %cst = arith.constant dense<0.000000e+00> : vector<8x128xf32>
    %2 = tpu.matmul %0, %1, %cst {dimension_numbers = #tpu.dot_dimension_numbers<[1], [0], [0], [1], [0, 0, 1, 1], [], []>} : vector<8x128xbf16>, vector<128x128xbf16>, vector<8x128xf32> -> vector<8x128xf32>
    %c0_3 = arith.constant 0 : index
    %c0_4 = arith.constant 0 : index
    %3 = vector.load %arg3[%c0_3, %c0_4] : memref<1x128xf32, #tpu.memory_space<vmem>>, vector<1x128xf32>
    %4 = vector.broadcast %3 : vector<1x128xf32> to vector<8x128xf32>
    %5 = arith.addf %2, %4 : vector<8x128xf32>
    %cst_5 = arith.constant 0.000000e+00 : f32
    %6 = vector.broadcast %cst_5 : f32 to vector<8x128xf32>
    %7 = arith.maximumf %5, %6 : vector<8x128xf32>
    %8 = arith.truncf %7 : vector<8x128xf32> to vector<8x128xbf16>
    %c0_6 = arith.constant 0 : index
    %c0_7 = arith.constant 0 : index
    %9 = vector.load %arg4[%c0_6, %c0_7] : memref<128x128xbf16, #tpu.memory_space<vmem>>, vector<128x128xbf16>
    %cst_8 = arith.constant dense<0.000000e+00> : vector<8x128xf32>
    %10 = tpu.matmul %8, %9, %cst_8 {dimension_numbers = #tpu.dot_dimension_numbers<[1], [0], [0], [1], [0, 0, 1, 1], [], []>} : vector<8x128xbf16>, vector<128x128xbf16>, vector<8x128xf32> -> vector<8x128xf32>
    %c0_9 = arith.constant 0 : index
    %c0_10 = arith.constant 0 : index
    %11 = vector.load %arg5[%c0_9, %c0_10] : memref<1x128xf32, #tpu.memory_space<vmem>>, vector<1x128xf32>
    %12 = vector.broadcast %11 : vector<1x128xf32> to vector<8x128xf32>
    %13 = arith.addf %10, %12 : vector<8x128xf32>
    %c0_11 = arith.constant 0 : index
    %c0_12 = arith.constant 0 : index
    %14 = vector.load %arg6[%c0_11, %c0_12] : memref<8x128xf32, #tpu.memory_space<vmem>>, vector<8x128xf32>
    tpu.vector_store %arg6[%c0_11, %c0_12], %13 {strides = array<i32>} : memref<8x128xf32, #tpu.memory_space<vmem>>, vector<8x128xf32>,
    return
  }
  func.func @transform_0(%arg0: i32) -> (i32, i32) {
    %c0_i32 = arith.constant 0 : i32
    %c0_i32_0 = arith.constant 0 : i32
    return %arg0, %c0_i32 : i32, i32
  }
  func.func @transform_1(%arg0: i32) -> (i32, i32) {
    %c0_i32 = arith.constant 0 : i32
    %c0_i32_0 = arith.constant 0 : i32
    %c0_i32_1 = arith.constant 0 : i32
    return %c0_i32, %c0_i32_0 : i32, i32
  }
  func.func @transform_2(%arg0: i32) -> (i32, i32) {
    %c0_i32 = arith.constant 0 : i32
    %c0_i32_0 = arith.constant 0 : i32
    %c0_i32_1 = arith.constant 0 : i32
    return %c0_i32, %c0_i32_0 : i32, i32
  }
  func.func @transform_3(%arg0: i32) -> (i32, i32) {
    %c0_i32 = arith.constant 0 : i32
    %c0_i32_0 = arith.constant 0 : i32
    %c0_i32_1 = arith.constant 0 : i32
    return %c0_i32, %c0_i32_0 : i32, i32
  }
  func.func @transform_4(%arg0: i32) -> (i32, i32) {
    %c0_i32 = arith.constant 0 : i32
    %c0_i32_0 = arith.constant 0 : i32
    %c0_i32_1 = arith.constant 0 : i32
    return %c0_i32, %c0_i32_0 : i32, i32
  }
  func.func @transform_5(%arg0: i32) -> (i32, i32) {
    %c0_i32 = arith.constant 0 : i32
    %c0_i32_0 = arith.constant 0 : i32
    return %arg0, %c0_i32 : i32, i32
  }
}

</mosaic_0001>

<bundles_post_ra>
// kernel: _bob_forward.1
= control target key start
LH: loop header
LB: loop body
LE: loop exit
PB: predicated region body
PF: predicated region fallthrough
CT: control target
= control target key end

     0   :  { %10 = vsyncpa [#allocation3], 0  ;;  %s455_s0 = inlined_call_operand.vmem [shape: bf16[8,128], index: 0, kind: input, shape index: {}]   ;;  %s456_s1 = inlined_call_operand.hbm [shape: bf16[128,128], index: 1, kind: input, shape index: {}]   ;;  %s457_s2 = inlined_call_operand.vmem [shape: f32[1,128], index: 2, kind: input, shape index: {}]   ;;  %s458_s3 = inlined_call_operand.hbm [shape: bf16[128,128], index: 3, kind: input, shape index: {}]   ;;  %s459_s4 = inlined_call_operand.vmem [shape: f32[1,128], index: 4, kind: input, shape index: {}]   ;;  %s460_s5 = inlined_call_operand.hbm [shape: f32[8,128], index: 5, kind: output, shape index: {}]  }
   0x1   :  { %11 = vsyncpa [#allocation6], 0 }
   0x2   :  { %12 = vsyncpa [#allocation4], 0  ;;  %s19_s20 = sshll.u32 %s456_s1, 4  ;;  %s402_s21 = smov [#allocation2]   ;;  %s20_s20 = int_to_ptr.hbm [resolvable:$true] %s19_s20 }
   0x3   :  { %s21_s22 = sshll.u32 %s402_s21, 4  ;;  %s34_s25 = sshll.u32 %s458_s3, 4  ;;  %s22_s22 = int_to_ptr.vmem [resolvable:$true] %s21_s22  ;;  %s35_s25 = int_to_ptr.hbm [resolvable:$true] %s34_s25 }
   0x4   :  { %s403_s26 = smov 64   ;;  %s404_s27 = smov 4  }
   0x5   :  { %27 = dma.hbm_to_vmem [thread:$0]  %s20_s20, 1024, %s22_s22, [#allocation3], %s403_s26, %s403_s26, %s404_s27  }
   0x6   :  { %s405_s28 = smov [#allocation5]  }
   0x7   :  { %s36_s29 = sshll.u32 %s405_s28, 4  ;;  %s37_s29 = int_to_ptr.vmem [resolvable:$true] %s36_s29 }
   0x8   :  { %42 = dma.hbm_to_vmem [thread:$0]  %s35_s25, 1024, %s37_s29, [#allocation6], %s403_s26, %s403_s26, %s404_s27  }
   0x9   :  { %396 = dma.done.wait [#allocation3], 1024  }
   0xa   :  { %397 = vsyncadd [#allocation3], 4294966272 }
   0xb   :  { %398 = dma.done.wait [#allocation6], 1024  }
   0xc   :  { %399 = vsyncadd [#allocation6], 4294966272  ;;  %v308_v0 = vld [vmem:[#allocation2 + $0x38] sm:$0xff]  ;;  %v307_v1 = vld [vmem:[#allocation2 + $0x30] sm:$0xff]  ;;  %s226_s12 = sshll.u32 %s460_s5, 4  ;;  %s227_s12 = int_to_ptr.hbm [resolvable:$true] %s226_s12 }
   0xd   :  { %122 = vmatpush.bf16.msra.mxu0 %v308_v0  ;;  %v316_v2 = vld [vmem:[#allocation5 + $0x38] sm:$0xff]  ;;  %v315_v3 = vld [vmem:[#allocation5 + $0x30] sm:$0xff]  ;;  %v306_v4 = vld [vmem:[#allocation2 + $0x28] sm:$0xff] }
   0xe   :  { %205 = vmatpush.bf16.msra.mxu1 %v316_v2  ;;  %v314_v5 = vld [vmem:[#allocation5 + $0x28] sm:$0xff]  ;;  %v305_v6 = vld [vmem:[#allocation2 + $0x20] sm:$0xff]  ;;  %v304_v8 = vld [vmem:[#allocation2 + $0x18] sm:$0xff] }
   0xf   :  { %v313_v7 = vld [vmem:[#allocation5 + $0x20] sm:$0xff]  ;;  %v312_v9 = vld [vmem:[#allocation5 + $0x18] sm:$0xff]  ;;  %v303_v10 = vld [vmem:[#allocation2 + $0x10] sm:$0xff] }
  0x10   :  { %v311_v11 = vld [vmem:[#allocation5 + $0x10] sm:$0xff]  ;;  %v302_v12 = vld [vmem:[#allocation2 + $0x8] sm:$0xff]  ;;  %v301_v13 = vld [vmem:[#allocation2] sm:$0xff] }
  0x11   :  { %123 = vmatpush.bf16.msra.mxu0 %v307_v1  ;;  %v53_v14 = vld [vmem:[%s455_s0] sm:$0xf]  ;;  %v310_v15 = vld [vmem:[#allocation5 + $0x8] sm:$0xff]  ;;  %s406_s0 = smov [#allocation7]  }
  0x12   :  { %206 = vmatpush.bf16.msra.mxu1 %v315_v3  ;;  %v309_v16 = vld [vmem:[#allocation5] sm:$0xff]  ;;  %s224_s9 = sshll.u32 %s406_s0, 4  ;;  %s225_s9 = int_to_ptr.vmem [resolvable:$true] %s224_s9 }
  0x13   :  { %v322_v17 = vld [vmem:[%s457_s2] ss:$0 sm:$0xff] }
  0x14   :  { %v323_v23 = vld [vmem:[%s459_s4] ss:$0 sm:$0xff] }
  0x15   :  { %124 = vmatpush.bf16.msra.mxu0 %v306_v4 }
  0x16   :  { %207 = vmatpush.bf16.msra.mxu1 %v314_v5 }
  0x19   :  { %125 = vmatpush.bf16.msra.mxu0 %v305_v6 }
  0x1a   :  { %208 = vmatpush.bf16.msra.mxu1 %v313_v7 }
  0x1d   :  { %126 = vmatpush.bf16.msra.mxu0 %v304_v8 }
  0x1e   :  { %209 = vmatpush.bf16.msra.mxu1 %v312_v9 }
  0x21   :  { %127 = vmatpush.bf16.msra.mxu0 %v303_v10 }
  0x22   :  { %210 = vmatpush.bf16.msra.mxu1 %v311_v11 }
  0x25   :  { %128 = vmatpush.bf16.msra.mxu0 %v302_v12 }
  0x26   :  { %211 = vmatpush.bf16.msra.mxu1 %v310_v15 }
  0x29   :  { %129 = vmatpush.bf16.msra.mxu0 %v301_v13 }
  0x2a   :  { %212 = vmatpush.bf16.msra.mxu1 %v309_v16 }
  0x2c   :  { %130 = vmatmul.bf16.vlgmr.msra.gmra.mxu0 %v53_v14 }
  0xa9   :  { %v131_v18 = vpop.f32.mrf.mxu0 }
  0xaa   :  { %v132_v19 = vadd.f32 %v322_v17, %v131_v18 }
  0xac   :  { %v135_v20 = vmax.f32 %v132_v19, 0.0 }
  0xae   :  { %v136_v21 = vpack.c.bf16 %v135_v20, %v135_v20 }
  0xb0   :  { %213 = vmatmul.bf16.vlgmr.msra.gmra.mxu1 %v136_v21 }
  0xb1   :  { %v133_v22 = vpop.f32.mrf.mxu0 }
 0x12d   :  { %v214_v24 = vpop.f32.mrf.mxu1 }
 0x12e   :  { %v215_v25 = vadd.f32 %v323_v23, %v214_v24 }
 0x130   :  { %218 = vst [vmem:[#allocation7] sm:$0xff] %v215_v25 }
 0x131   :  { %229 = dma.vmem_to_hbm [thread:$0]  %s225_s9, 128, %s227_s12, [#allocation4]  }
 0x135   :  { %v216_v26 = vpop.f32.mrf.mxu1 }
 0x136   :  { %400 = dma.done.wait [#allocation4], 128  }
 0x137   :  { %401 = vsyncadd [#allocation4], 4294967168 }
 0x138   :  { %234 = vsyncpa [#allocation3], 1 }
 0x139   :  { %235 = vsyncpa [#allocation6], 1 }
 0x13a   :  { %236 = vsyncpa [#allocation4], 1 }

// kernel: _bob_forward.1
= control target key start
LH: loop header
LB: loop body
LE: loop exit
PB: predicated region body
PF: predicated region fallthrough
CT: control target
= control target key end

     0   :  { %10 = vsyncpa [#allocation3], 0  ;;  %s455_s0 = inlined_call_operand.vmem [shape: bf16[8,128], index: 0, kind: input, shape index: {}]   ;;  %s456_s1 = inlined_call_operand.hbm [shape: bf16[128,128], index: 1, kind: input, shape index: {}]   ;;  %s457_s2 = inlined_call_operand.vmem [shape: f32[1,128], index: 2, kind: input, shape index: {}]   ;;  %s458_s3 = inlined_call_operand.hbm [shape: bf16[128,128], index: 3, kind: input, shape index: {}]   ;;  %s459_s4 = inlined_call_operand.vmem [shape: f32[1,128], index: 4, kind: input, shape index: {}]   ;;  %s460_s5 = inlined_call_operand.hbm [shape: f32[8,128], index: 5, kind: output, shape index: {}]  }
   0x1   :  { %11 = vsyncpa [#allocation6], 0 }
   0x2   :  { %12 = vsyncpa [#allocation4], 0  ;;  %s19_s20 = sshll.u32 %s456_s1, 4  ;;  %s402_s21 = smov [#allocation2]   ;;  %s20_s20 = int_to_ptr.hbm [resolvable:$true] %s19_s20 }
   0x3   :  { %s21_s22 = sshll.u32 %s402_s21, 4  ;;  %s34_s25 = sshll.u32 %s458_s3, 4  ;;  %s22_s22 = int_to_ptr.vmem [resolvable:$true] %s21_s22  ;;  %s35_s25 = int_to_ptr.hbm [resolvable:$true] %s34_s25 }
   0x4   :  { %s403_s26 = smov 64   ;;  %s404_s27 = smov 4  }
   0x5   :  { %27 = dma.hbm_to_vmem [thread:$0]  %s20_s20, 1024, %s22_s22, [#allocation3], %s403_s26, %s403_s26, %s404_s27  }
   0x6   :  { %s405_s28 = smov [#allocation5]  }
   0x7   :  { %s36_s29 = sshll.u32 %s405_s28, 4  ;;  %s37_s29 = int_to_ptr.vmem [resolvable:$true] %s36_s29 }
   0x8   :  { %42 = dma.hbm_to_vmem [thread:$0]  %s35_s25, 1024, %s37_s29, [#allocation6], %s403_s26, %s403_s26, %s404_s27  }
   0x9   :  { %396 = dma.done.wait [#allocation3], 1024  }
   0xa   :  { %397 = vsyncadd [#allocation3], 4294966272 }
   0xb   :  { %398 = dma.done.wait [#allocation6], 1024  }
   0xc   :  { %399 = vsyncadd [#allocation6], 4294966272  ;;  %v308_v0 = vld [vmem:[#allocation2 + $0x38] sm:$0xff]  ;;  %v307_v1 = vld [vmem:[#allocation2 + $0x30] sm:$0xff]  ;;  %s226_s12 = sshll.u32 %s460_s5, 4  ;;  %s227_s12 = int_to_ptr.hbm [resolvable:$true] %s226_s12 }
   0xd   :  { %122 = vmatpush.bf16.msra.mxu0 %v308_v0  ;;  %v316_v2 = vld [vmem:[#allocation5 + $0x38] sm:$0xff]  ;;  %v315_v3 = vld [vmem:[#allocation5 + $0x30] sm:$0xff]  ;;  %v306_v4 = vld [vmem:[#allocation2 + $0x28] sm:$0xff] }
   0xe   :  { %205 = vmatpush.bf16.msra.mxu1 %v316_v2  ;;  %v314_v5 = vld [vmem:[#allocation5 + $0x28] sm:$0xff]  ;;  %v305_v6 = vld [vmem:[#allocation2 + $0x20] sm:$0xff]  ;;  %v304_v8 = vld [vmem:[#allocation2 + $0x18] sm:$0xff] }
   0xf   :  { %v313_v7 = vld [vmem:[#allocation5 + $0x20] sm:$0xff]  ;;  %v312_v9 = vld [vmem:[#allocation5 + $0x18] sm:$0xff]  ;;  %v303_v10 = vld [vmem:[#allocation2 + $0x10] sm:$0xff] }
  0x10   :  { %v311_v11 = vld [vmem:[#allocation5 + $0x10] sm:$0xff]  ;;  %v302_v12 = vld [vmem:[#allocation2 + $0x8] sm:$0xff]  ;;  %v301_v13 = vld [vmem:[#allocation2] sm:$0xff] }
  0x11   :  { %123 = vmatpush.bf16.msra.mxu0 %v307_v1  ;;  %v53_v14 = vld [vmem:[%s455_s0] sm:$0xf]  ;;  %v310_v15 = vld [vmem:[#allocation5 + $0x8] sm:$0xff]  ;;  %s406_s0 = smov [#allocation7]  }
  0x12   :  { %206 = vmatpush.bf16.msra.mxu1 %v315_v3  ;;  %v309_v16 = vld [vmem:[#allocation5] sm:$0xff]  ;;  %s224_s9 = sshll.u32 %s406_s0, 4  ;;  %s225_s9 = int_to_ptr.vmem [resolvable:$true] %s224_s9 }
  0x13   :  { %v322_v17 = vld [vmem:[%s457_s2] ss:$0 sm:$0xff] }
  0x14   :  { %v323_v23 = vld [vmem:[%s459_s4] ss:$0 sm:$0xff] }
  0x15   :  { %124 = vmatpush.bf16.msra.mxu0 %v306_v4 }
  0x16   :  { %207 = vmatpush.bf16.msra.mxu1 %v314_v5 }
  0x19   :  { %125 = vmatpush.bf16.msra.mxu0 %v305_v6 }
  0x1a   :  { %208 = vmatpush.bf16.msra.mxu1 %v313_v7 }
  0x1d   :  { %126 = vmatpush.bf16.msra.mxu0 %v304_v8 }
  0x1e   :  { %209 = vmatpush.bf16.msra.mxu1 %v312_v9 }
  0x21   :  { %127 = vmatpush.bf16.msra.mxu0 %v303_v10 }
  0x22   :  { %210 = vmatpush.bf16.msra.mxu1 %v311_v11 }
  0x25   :  { %128 = vmatpush.bf16.msra.mxu0 %v302_v12 }
  0x26   :  { %211 = vmatpush.bf16.msra.mxu1 %v310_v15 }
  0x29   :  { %129 = vmatpush.bf16.msra.mxu0 %v301_v13 }
  0x2a   :  { %212 = vmatpush.bf16.msra.mxu1 %v309_v16 }
  0x2c   :  { %130 = vmatmul.bf16.vlgmr.msra.gmra.mxu0 %v53_v14 }
  0xa9   :  { %v131_v18 = vpop.f32.mrf.mxu0 }
  0xaa   :  { %v132_v19 = vadd.f32 %v322_v17, %v131_v18 }
  0xac   :  { %v135_v20 = vmax.f32 %v132_v19, 0.0 }
  0xae   :  { %v136_v21 = vpack.c.bf16 %v135_v20, %v135_v20 }
  0xb0   :  { %213 = vmatmul.bf16.vlgmr.msra.gmra.mxu1 %v136_v21 }
  0xb1   :  { %v133_v22 = vpop.f32.mrf.mxu0 }
 0x12d   :  { %v214_v24 = vpop.f32.mrf.mxu1 }
 0x12e   :  { %v215_v25 = vadd.f32 %v323_v23, %v214_v24 }
 0x130   :  { %218 = vst [vmem:[#allocation7] sm:$0xff] %v215_v25 }
 0x131   :  { %229 = dma.vmem_to_hbm [thread:$0]  %s225_s9, 128, %s227_s12, [#allocation4]  }
 0x135   :  { %v216_v26 = vpop.f32.mrf.mxu1 }
 0x136   :  { %400 = dma.done.wait [#allocation4], 128  }
 0x137   :  { %401 = vsyncadd [#allocation4], 4294967168 }
 0x138   :  { %234 = vsyncpa [#allocation3], 1 }
 0x139   :  { %235 = vsyncpa [#allocation6], 1 }
 0x13a   :  { %236 = vsyncpa [#allocation4], 1 }

</bundles_post_ra>
